<compile_context>
chip_gen: v6e
topology: v6e:2x2x1
jax: 0.10.0
libtpu: 0.0.40
codegen_flags: <defaults>
</compile_context>

<pallas_src>
import functools
import math

import jax
import jax.numpy as jnp
from jax.experimental import pallas as pl
from jax.experimental.pallas import tpu as pltpu

# inv_softplus(1.0): bias used by torchrl's "biased_softplus_1.0" mapping.
_SOFTPLUS_BIAS = math.log(math.e - 1.0)
_SCALE_LB = 1e-4


def _round_up(x, m):
    return (x + m - 1) // m * m


def _softplus(x):
    # numerically stable softplus, elementwise (VPU + EUP), f32
    return jnp.where(x > 20.0, x, jnp.log1p(jnp.exp(jnp.minimum(x, 20.0))))


def ppo_kernel(x_ref,
               w1_ref, w2_ref, w3_ref, wh_ref,
               b123_ref, bh_ref,
               out_ref, *, scale_start):
    # x / weights are bf16 (cast once in the wrapper); accumulate in f32.
    x = x_ref[...]

    h = jnp.tanh(jnp.dot(x, w1_ref[...], preferred_element_type=jnp.float32)
                 + b123_ref[0:1, :])
    h = jnp.tanh(jnp.dot(h.astype(jnp.bfloat16), w2_ref[...],
                         preferred_element_type=jnp.float32) + b123_ref[1:2, :])
    h = jnp.tanh(jnp.dot(h.astype(jnp.bfloat16), w3_ref[...],
                         preferred_element_type=jnp.float32) + b123_ref[2:3, :])

    # Single fused head matmul: loc lanes [0:scale_start), scale lanes
    # [scale_start:). One lane-dense output tile -> one HBM write stream.
    out = (jnp.dot(h.astype(jnp.bfloat16), wh_ref[...],
                   preferred_element_type=jnp.float32) + bh_ref[...])

    lane = jax.lax.broadcasted_iota(jnp.int32, out.shape, 1)
    scale = jnp.maximum(_softplus(out + _SOFTPLUS_BIAS), _SCALE_LB)
    out_ref[...] = jnp.where(lane >= scale_start, scale, out).astype(out_ref.dtype)


def prepare_params(params):
    """One-time parameter prep (call once, reuse across forwards).

    Pads to hardware tiles, casts weights to bf16, fuses the loc/scale heads
    into a single lane-dense head weight, and packs the biases.
    Returns (prep_dict, half, scale_start).
    """
    w1, w2, w3, w4 = params["w1"], params["w2"], params["w3"], params["w4"]
    b1, b2, b3, b4 = params["b1"], params["b2"], params["b3"], params["b4"]

    f, c = w1.shape
    n_out = w4.shape[1]
    assert n_out % 2 == 0, "n_outputs must be even for the loc/scale split"
    half = n_out // 2

    f_pad = _round_up(f, 128)
    c_pad = _round_up(c, 128)
    if half <= 64:
        out_pad, scale_start = 128, 64          # both heads share one 128-lane tile
    else:
        h_pad = _round_up(half, 128)
        out_pad, scale_start = 2 * h_pad, h_pad  # 128-aligned lane halves

    def pad2(a, rows, cols):
        return jnp.pad(a, ((0, rows - a.shape[0]), (0, cols - a.shape[1])))

    # Fused head weight / bias: loc cols in lanes [0:half], scale cols in
    # lanes [scale_start:scale_start+half]; all other lanes zero.
    wh = jnp.zeros((c, out_pad), jnp.float32)
    wh = wh.at[:, :half].set(w4[:, :half])
    wh = wh.at[:, scale_start:scale_start + half].set(w4[:, half:])
    bh = jnp.zeros((1, out_pad), jnp.float32)
    bh = bh.at[:, :half].set(b4[:, :half])
    bh = bh.at[:, scale_start:scale_start + half].set(b4[:, half:])

    prep = {
        "w1": pad2(w1, f_pad, c_pad).astype(jnp.bfloat16),
        "w2": pad2(w2, c_pad, c_pad).astype(jnp.bfloat16),
        "w3": pad2(w3, c_pad, c_pad).astype(jnp.bfloat16),
        "wh": pad2(wh, c_pad, out_pad).astype(jnp.bfloat16),
        "b123": jnp.concatenate([pad2(b1, 1, c_pad),
                                 pad2(b2, 1, c_pad),
                                 pad2(b3, 1, c_pad)], axis=0),  # (3, c_pad) f32
        "bh": bh,                                               # (1, out_pad) f32
    }
    return prep, half, scale_start


def _choose_batch_tile(b):
    """Pick (tb, b_pad): 16-sublane-aligned batch tile (bf16 x packing) and
    padded batch. Minimizes dead-row padding, keeps >=2 grid steps for
    moderate batches (v7x megacore), and amortizes per-step overhead."""
    b16 = _round_up(b, 16)
    if b16 < 256:
        return b16, b16                       # tiny batch: one tile, no waste
    cands = {128, 256, 512, 1024}
    cands.add(min(1024, _round_up(-(-b16 // 2), 16)))   # ~2-way split
    cands.add(min(1024, _round_up(-(-b16 // 4), 16)))   # ~4-way split
    best_cost, best_tb = None, 128
    for tb in sorted(cands):
        if tb > b16 // 2:
            continue                          # keep >= 2 grid steps
        b_pad = _round_up(b16, tb)
        # cost = dead rows + per-grid-step overhead (~16 rows worth each)
        cost = (b_pad - b16) + 16 * (b_pad // tb)
        if best_cost is None or cost < best_cost or (cost == best_cost
                                                     and tb > best_tb):
            best_cost, best_tb = cost, tb
    return best_tb, _round_up(b16, best_tb)


def ppo_forward(x, prep, *, half, scale_start):
    """x: [B, in_features] f32. prep: output of prepare_params.

    Returns (loc, scale), each [B, n_outputs // 2] f32.
    """
    b, f = x.shape
    f_pad, c_pad = prep["w1"].shape
    out_pad = prep["wh"].shape[1]

    tb, b_pad = _choose_batch_tile(b)

    # Pad + cast x once (skip padding entirely if already aligned).
    if f == f_pad and b == b_pad:
        x_p = x.astype(jnp.bfloat16)
    else:
        x_p = jnp.pad(x.astype(jnp.bfloat16), ((0, b_pad - b), (0, f_pad - f)))

    # Constant-index (resident) weights: single-buffer on large nets so the
    # double-buffered copies don't eat v7x's 64 MiB VMEM.
    wmode = pl.Buffered(1) if c_pad >= 1024 else None

    def resident(rows, cols):
        if wmode is None:
            return pl.BlockSpec((rows, cols), lambda i: (0, 0))
        return pl.BlockSpec((rows, cols), lambda i: (0, 0), pipeline_mode=wmode)

    x_spec = pl.BlockSpec((tb, f_pad), lambda i: (i, 0))
    out_spec = pl.BlockSpec((tb, out_pad), lambda i: (i, 0))

    flops = 2 * b_pad * (f_pad * c_pad + 2 * c_pad * c_pad + c_pad * out_pad)
    transcendentals = b_pad * (3 * c_pad + out_pad)
    bytes_accessed = (x_p.size * 2
                      + 2 * sum(prep[k].size for k in ("w1", "w2", "w3", "wh"))
                      + 4 * (prep["b123"].size + prep["bh"].size)
                      + 4 * b_pad * out_pad)

    out = pl.pallas_call(
        functools.partial(ppo_kernel, scale_start=scale_start),
        out_shape=jax.ShapeDtypeStruct((b_pad, out_pad), jnp.float32),
        grid=(b_pad // tb,),
        in_specs=[x_spec,
                  resident(f_pad, c_pad),
                  resident(c_pad, c_pad),
                  resident(c_pad, c_pad),
                  resident(c_pad, out_pad),
                  resident(3, c_pad),
                  resident(1, out_pad)],
        out_specs=out_spec,
        compiler_params=pltpu.CompilerParams(
            dimension_semantics=("parallel",)),
        cost_estimate=pl.CostEstimate(flops=flops,
                                      transcendentals=transcendentals,
                                      bytes_accessed=bytes_accessed),
    )(x_p, prep["w1"], prep["w2"], prep["w3"], prep["wh"],
      prep["b123"], prep["bh"])

    loc = out[:b, :half]
    scale = out[:b, scale_start:scale_start + half]
    return loc, scale


def init_ppo_params(key, in_features, num_cells, n_outputs):
    """PyTorch nn.Linear default init: U(-1/sqrt(fan_in), 1/sqrt(fan_in)).

    Weights stored as [in_features, out_features] (transposed from PyTorch's
    [out, in]) so the kernel computes x @ W + b directly.
    """
    dims = [(in_features, num_cells),
            (num_cells, num_cells),
            (num_cells, num_cells),
            (num_cells, n_outputs)]
    params = {}
    keys = jax.random.split(key, 2 * len(dims))
    for i, (fan_in, fan_out) in enumerate(dims):
        bound = 1.0 / math.sqrt(fan_in)
        params[f"w{i + 1}"] = jax.random.uniform(
            keys[2 * i], (fan_in, fan_out), jnp.float32, -bound, bound)
        params[f"b{i + 1}"] = jax.random.uniform(
            keys[2 * i + 1], (1, fan_out), jnp.float32, -bound, bound)
    return params


def ppo_reference(x, params):
    """Pure-JAX f32 reference of the module forward (correctness check)."""
    h = jnp.tanh(x @ params["w1"] + params["b1"])
    h = jnp.tanh(h @ params["w2"] + params["b2"])
    h = jnp.tanh(h @ params["w3"] + params["b3"])
    out = h @ params["w4"] + params["b4"]
    half = out.shape[-1] // 2
    loc = out[:, :half]
    scale = jnp.maximum(jax.nn.softplus(out[:, half:] + _SOFTPLUS_BIAS),
                        _SCALE_LB)
    return loc, scale


if __name__ == "__main__":
    # Small shapes consistent with the module (LazyLinear infers in_features
    # from the first input).
    batch = 2
    in_features = 16
    num_cells = 32
    n_outputs = 4          # must be even for the NormalParamExtractor split

    key = jax.random.PRNGKey(0)
    k_x, k_p = jax.random.split(key)
    x = jax.random.normal(k_x, (batch, in_features), jnp.float32)
    params = init_ppo_params(k_p, in_features, num_cells, n_outputs)

    # One-time weight prep (padded, bf16, fused head), reused every forward.
    prep, half, scale_start = prepare_params(params)
    prep = jax.tree_util.tree_map(jax.block_until_ready, prep)

    fwd = jax.jit(functools.partial(ppo_forward, half=half,
                                    scale_start=scale_start))
    loc, scale = fwd(x, prep)
    jax.block_until_ready((loc, scale))

    assert loc.shape == (batch, n_outputs // 2)
    assert scale.shape == (batch, n_outputs // 2)
    assert bool(jnp.all(scale >= _SCALE_LB))

    # Correctness vs. f32 reference (loose tolerance: bf16 matmul inputs).
    loc_ref, scale_ref = ppo_reference(x, params)
    assert bool(jnp.allclose(loc, loc_ref, atol=5e-2, rtol=5e-2))
    assert bool(jnp.allclose(scale, scale_ref, atol=5e-2, rtol=5e-2))

    print("KERNEL_OK")
</pallas_src>

<mosaic_0001>
module attributes {stable_mosaic.version = 11 : i64} {
  func.func @ppo_kernel(%arg0: i32, %arg1: memref<16x128xbf16, #tpu.memory_space<vmem>>, %arg2: memref<128x128xbf16, #tpu.memory_space<vmem>>, %arg3: memref<128x128xbf16, #tpu.memory_space<vmem>>, %arg4: memref<128x128xbf16, #tpu.memory_space<vmem>>, %arg5: memref<128x128xbf16, #tpu.memory_space<vmem>>, %arg6: memref<3x128xf32, #tpu.memory_space<vmem>>, %arg7: memref<1x128xf32, #tpu.memory_space<vmem>>, %arg8: memref<16x128xf32, #tpu.memory_space<vmem>>) attributes {dimension_semantics = [#tpu.dimension_semantics<parallel>], iteration_bounds = array<i64: 1>, scalar_prefetch = 0 : i64, scratch_operands = 0 : i64, tpu.core_type = #tpu.core_type<tc>, window_params = [{transform_indices = @transform_0, window_bounds = array<i64: 16, 128>}, {pipeline_mode = #tpu.pipeline_mode<synchronous>, transform_indices = @transform_1, window_bounds = array<i64: 128, 128>}, {pipeline_mode = #tpu.pipeline_mode<synchronous>, transform_indices = @transform_2, window_bounds = array<i64: 128, 128>}, {pipeline_mode = #tpu.pipeline_mode<synchronous>, transform_indices = @transform_3, window_bounds = array<i64: 128, 128>}, {pipeline_mode = #tpu.pipeline_mode<synchronous>, transform_indices = @transform_4, window_bounds = array<i64: 128, 128>}, {pipeline_mode = #tpu.pipeline_mode<synchronous>, transform_indices = @transform_5, window_bounds = array<i64: 3, 128>}, {pipeline_mode = #tpu.pipeline_mode<synchronous>, transform_indices = @transform_6, window_bounds = array<i64: 1, 128>}, {transform_indices = @transform_7, window_bounds = array<i64: 16, 128>}]} {
    %c0 = arith.constant 0 : index
    %c0_0 = arith.constant 0 : index
    %0 = vector.load %arg1[%c0, %c0_0] : memref<16x128xbf16, #tpu.memory_space<vmem>>, vector<16x128xbf16>
    %c0_1 = arith.constant 0 : index
    %c0_2 = arith.constant 0 : index
    %1 = vector.load %arg2[%c0_1, %c0_2] : memref<128x128xbf16, #tpu.memory_space<vmem>>, vector<128x128xbf16>
    %cst = arith.constant dense<0.000000e+00> : vector<16x128xf32>
    %2 = tpu.matmul %0, %1, %cst {dimension_numbers = #tpu.dot_dimension_numbers<[1], [0], [0], [1], [0, 0, 1, 1], [], []>} : vector<16x128xbf16>, vector<128x128xbf16>, vector<16x128xf32> -> vector<16x128xf32>
    %c0_3 = arith.constant 0 : index
    %c0_4 = arith.constant 0 : index
    %3 = vector.load %arg6[%c0_3, %c0_4] : memref<3x128xf32, #tpu.memory_space<vmem>>, vector<1x128xf32>
    %4 = vector.broadcast %3 : vector<1x128xf32> to vector<16x128xf32>
    %5 = arith.addf %2, %4 : vector<16x128xf32>
    %6 = math.tanh %5 : vector<16x128xf32>
    %7 = arith.truncf %6 : vector<16x128xf32> to vector<16x128xbf16>
    %c0_5 = arith.constant 0 : index
    %c0_6 = arith.constant 0 : index
    %8 = vector.load %arg3[%c0_5, %c0_6] : memref<128x128xbf16, #tpu.memory_space<vmem>>, vector<128x128xbf16>
    %cst_7 = arith.constant dense<0.000000e+00> : vector<16x128xf32>
    %9 = tpu.matmul %7, %8, %cst_7 {dimension_numbers = #tpu.dot_dimension_numbers<[1], [0], [0], [1], [0, 0, 1, 1], [], []>} : vector<16x128xbf16>, vector<128x128xbf16>, vector<16x128xf32> -> vector<16x128xf32>
    %c1 = arith.constant 1 : index
    %c0_8 = arith.constant 0 : index
    %10 = vector.load %arg6[%c1, %c0_8] : memref<3x128xf32, #tpu.memory_space<vmem>>, vector<1x128xf32>
    %11 = vector.broadcast %10 : vector<1x128xf32> to vector<16x128xf32>
    %12 = arith.addf %9, %11 : vector<16x128xf32>
    %13 = math.tanh %12 : vector<16x128xf32>
    %14 = arith.truncf %13 : vector<16x128xf32> to vector<16x128xbf16>
    %c0_9 = arith.constant 0 : index
    %c0_10 = arith.constant 0 : index
    %15 = vector.load %arg4[%c0_9, %c0_10] : memref<128x128xbf16, #tpu.memory_space<vmem>>, vector<128x128xbf16>
    %cst_11 = arith.constant dense<0.000000e+00> : vector<16x128xf32>
    %16 = tpu.matmul %14, %15, %cst_11 {dimension_numbers = #tpu.dot_dimension_numbers<[1], [0], [0], [1], [0, 0, 1, 1], [], []>} : vector<16x128xbf16>, vector<128x128xbf16>, vector<16x128xf32> -> vector<16x128xf32>
    %c2 = arith.constant 2 : index
    %c0_12 = arith.constant 0 : index
    %17 = vector.load %arg6[%c2, %c0_12] : memref<3x128xf32, #tpu.memory_space<vmem>>, vector<1x128xf32>
    %18 = vector.broadcast %17 : vector<1x128xf32> to vector<16x128xf32>
    %19 = arith.addf %16, %18 : vector<16x128xf32>
    %20 = math.tanh %19 : vector<16x128xf32>
    %21 = arith.truncf %20 : vector<16x128xf32> to vector<16x128xbf16>
    %c0_13 = arith.constant 0 : index
    %c0_14 = arith.constant 0 : index
    %22 = vector.load %arg5[%c0_13, %c0_14] : memref<128x128xbf16, #tpu.memory_space<vmem>>, vector<128x128xbf16>
    %cst_15 = arith.constant dense<0.000000e+00> : vector<16x128xf32>
    %23 = tpu.matmul %21, %22, %cst_15 {dimension_numbers = #tpu.dot_dimension_numbers<[1], [0], [0], [1], [0, 0, 1, 1], [], []>} : vector<16x128xbf16>, vector<128x128xbf16>, vector<16x128xf32> -> vector<16x128xf32>
    %c0_16 = arith.constant 0 : index
    %c0_17 = arith.constant 0 : index
    %24 = vector.load %arg7[%c0_16, %c0_17] : memref<1x128xf32, #tpu.memory_space<vmem>>, vector<1x128xf32>
    %25 = vector.broadcast %24 : vector<1x128xf32> to vector<16x128xf32>
    %26 = arith.addf %23, %25 : vector<16x128xf32>
    %27 = tpu.iota {dimensions = array<i32: 1>} : vector<16x128xi32>
    %cst_18 = arith.constant 0.541324854 : f32
    %28 = vector.broadcast %cst_18 : f32 to vector<16x128xf32>
    %29 = arith.addf %26, %28 : vector<16x128xf32>
    %cst_19 = arith.constant 2.000000e+01 : f32
    %30 = vector.broadcast %cst_19 : f32 to vector<16x128xf32>
    %31 = arith.cmpf ogt, %29, %30 : vector<16x128xf32>
    %cst_20 = arith.constant 2.000000e+01 : f32
    %32 = vector.broadcast %cst_20 : f32 to vector<16x128xf32>
    %33 = arith.minimumf %29, %32 : vector<16x128xf32>
    %34 = math.exp %33 : vector<16x128xf32>
    %35 = math.log1p %34 : vector<16x128xf32>
    %36 = arith.select %31, %29, %35 : vector<16x128xi1>, vector<16x128xf32>
    %cst_21 = arith.constant 9.99999974E-5 : f32
    %37 = vector.broadcast %cst_21 : f32 to vector<16x128xf32>
    %38 = arith.maximumf %36, %37 : vector<16x128xf32>
    %c64_i32 = arith.constant 64 : i32
    %39 = vector.broadcast %c64_i32 : i32 to vector<16x128xi32>
    %40 = arith.cmpi sge, %27, %39 : vector<16x128xi32>
    %41 = arith.select %40, %38, %26 : vector<16x128xi1>, vector<16x128xf32>
    %c0_22 = arith.constant 0 : index
    %c0_23 = arith.constant 0 : index
    %42 = vector.load %arg8[%c0_22, %c0_23] : memref<16x128xf32, #tpu.memory_space<vmem>>, vector<16x128xf32>
    tpu.vector_store %arg8[%c0_22, %c0_23], %41 {strides = array<i32>} : memref<16x128xf32, #tpu.memory_space<vmem>>, vector<16x128xf32>,
    return
  }
  func.func @transform_0(%arg0: i32) -> (i32, i32) {
    %c0_i32 = arith.constant 0 : i32
    %c0_i32_0 = arith.constant 0 : i32
    return %arg0, %c0_i32 : i32, i32
  }
  func.func @transform_1(%arg0: i32) -> (i32, i32) {
    %c0_i32 = arith.constant 0 : i32
    %c0_i32_0 = arith.constant 0 : i32
    %c0_i32_1 = arith.constant 0 : i32
    return %c0_i32, %c0_i32_0 : i32, i32
  }
  func.func @transform_2(%arg0: i32) -> (i32, i32) {
    %c0_i32 = arith.constant 0 : i32
    %c0_i32_0 = arith.constant 0 : i32
    %c0_i32_1 = arith.constant 0 : i32
    return %c0_i32, %c0_i32_0 : i32, i32
  }
  func.func @transform_3(%arg0: i32) -> (i32, i32) {
    %c0_i32 = arith.constant 0 : i32
    %c0_i32_0 = arith.constant 0 : i32
    %c0_i32_1 = arith.constant 0 : i32
    return %c0_i32, %c0_i32_0 : i32, i32
  }
  func.func @transform_4(%arg0: i32) -> (i32, i32) {
    %c0_i32 = arith.constant 0 : i32
    %c0_i32_0 = arith.constant 0 : i32
    %c0_i32_1 = arith.constant 0 : i32
    return %c0_i32, %c0_i32_0 : i32, i32
  }
  func.func @transform_5(%arg0: i32) -> (i32, i32) {
    %c0_i32 = arith.constant 0 : i32
    %c0_i32_0 = arith.constant 0 : i32
    %c0_i32_1 = arith.constant 0 : i32
    return %c0_i32, %c0_i32_0 : i32, i32
  }
  func.func @transform_6(%arg0: i32) -> (i32, i32) {
    %c0_i32 = arith.constant 0 : i32
    %c0_i32_0 = arith.constant 0 : i32
    %c0_i32_1 = arith.constant 0 : i32
    return %c0_i32, %c0_i32_0 : i32, i32
  }
  func.func @transform_7(%arg0: i32) -> (i32, i32) {
    %c0_i32 = arith.constant 0 : i32
    %c0_i32_0 = arith.constant 0 : i32
    return %arg0, %c0_i32 : i32, i32
  }
}

</mosaic_0001>

<bundles_post_ra>
// kernel: ppo_forward.1
= control target key start
LH: loop header
LB: loop body
LE: loop exit
PB: predicated region body
PF: predicated region fallthrough
CT: control target
= control target key end

     0   :  { %12 = vsyncpa [#allocation3], 0  ;;  %s1020_s0 = inlined_call_operand.vmem [shape: bf16[16,128], index: 0, kind: input, shape index: {}]   ;;  %s1021_s1 = inlined_call_operand.hbm [shape: bf16[128,128], index: 1, kind: input, shape index: {}]   ;;  %s1022_s2 = inlined_call_operand.hbm [shape: bf16[128,128], index: 2, kind: input, shape index: {}]   ;;  %s1023_s3 = inlined_call_operand.hbm [shape: bf16[128,128], index: 3, kind: input, shape index: {}]   ;;  %s1024_s4 = inlined_call_operand.hbm [shape: bf16[128,128], index: 4, kind: input, shape index: {}]   ;;  %s1025_s5 = inlined_call_operand.vmem [shape: f32[3,128], index: 5, kind: input, shape index: {}]   ;;  %s1026_s6 = inlined_call_operand.vmem [shape: f32[1,128], index: 6, kind: input, shape index: {}]   ;;  %s1027_s7 = inlined_call_operand.vmem [shape: f32[16,128], index: 7, kind: output, shape index: {}]  }
   0x1   :  { %13 = vsyncpa [#allocation5], 0 }
   0x2   :  { %14 = vsyncpa [#allocation8], 0  ;;  %s887_s24 = smov [#allocation4]   ;;  %s888_s26 = smov [#allocation2]  }
   0x3   :  { %s34_s25 = sshll.u32 %s887_s24, 4  ;;  %s22_s27 = sshll.u32 %s888_s26, 4  ;;  %s35_s25 = int_to_ptr.vmem [resolvable:$true] %s34_s25  ;;  %s23_s27 = int_to_ptr.vmem [resolvable:$true] %s22_s27 }
   0x4   :  { %s809_s28 = scalar_lea.vmem %s35_s25, 1024  ;;  %p814_p1 = scmp.lt.s32.totalorder %s35_s25, %s35_s25 }
   0x5   :  { %p810_p0 = scmp.ne.s32.totalorder %s35_s25, %s809_s28  ;;  %p815_p2 = scmp.lt.s32.totalorder %s809_s28, %s809_s28 }
   0x7   :  { %p816_p3 = por %p815_p2, %p814_p1 }
   0x9   :  { %p817_p4 = pnand %p816_p3, %p810_p0 }
   0xb   :  { %820 = shalt.err (!%p817_p4)
}
   0xc   :  { %s889_s29 = smov 64   ;;  %s890_s30 = smov 4  }
   0xd   :  { %40 = dma.hbm_to_vmem [thread:$0]  %s1022_s2, 1024, %s35_s25, [#allocation5], %s889_s29, %s889_s29, %s890_s30  }
   0xe   :  { %s829_s10 = scalar_lea.vmem %s23_s27, 1024  ;;  %p834_p6 = scmp.lt.s32.totalorder %s23_s27, %s23_s27 }
   0xf   :  { %p830_p5 = scmp.ne.s32.totalorder %s23_s27, %s829_s10  ;;  %p835_p7 = scmp.lt.s32.totalorder %s829_s10, %s829_s10 }
  0x11   :  { %p836_p8 = por %p835_p7, %p834_p6 }
  0x13   :  { %p837_p9 = pnand %p836_p8, %p830_p5 }
  0x15   :  { %840 = shalt.err (!%p837_p9)
}
  0x16   :  { %28 = dma.hbm_to_vmem [thread:$0]  %s1021_s1, 1024, %s23_s27, [#allocation3], %s889_s29, %s889_s29, %s890_s30  }
  0x17   :  { %s891_s13 = smov [#allocation6]   ;;  %s892_s15 = smov [#allocation7]  }
  0x18   :  { %s46_s14 = sshll.u32 %s891_s13, 4  ;;  %s58_s16 = sshll.u32 %s892_s15, 4  ;;  %s47_s14 = int_to_ptr.vmem [resolvable:$true] %s46_s14  ;;  %s59_s16 = int_to_ptr.vmem [resolvable:$true] %s58_s16 }
  0x19   :  { %s849_s2 = scalar_lea.vmem %s47_s14, 1024  ;;  %p854_p11 = scmp.lt.s32.totalorder %s47_s14, %s47_s14 }
  0x1a   :  { %p850_p10 = scmp.ne.s32.totalorder %s47_s14, %s849_s2  ;;  %p855_p12 = scmp.lt.s32.totalorder %s849_s2, %s849_s2 }
  0x1c   :  { %p856_p13 = por %p855_p12, %p854_p11 }
  0x1e   :  { %p857_p0 = pnand %p856_p13, %p850_p10 }
  0x20   :  { %860 = shalt.err (!%p857_p0)
}
  0x21   :  { %52 = dma.hbm_to_vmem [thread:$0]  %s1023_s3, 1024, %s47_s14, [#allocation5], %s889_s29, %s889_s29, %s890_s30  }
  0x22   :  { %s869_s1 = scalar_lea.vmem %s59_s16, 1024  ;;  %p874_p2 = scmp.lt.s32.totalorder %s59_s16, %s59_s16 }
  0x23   :  { %p870_p1 = scmp.ne.s32.totalorder %s59_s16, %s869_s1  ;;  %p875_p3 = scmp.lt.s32.totalorder %s869_s1, %s869_s1 }
  0x25   :  { %p876_p4 = por %p875_p3, %p874_p2 }
  0x27   :  { %p877_p5 = pnand %p876_p4, %p870_p1 }
  0x29   :  { %880 = shalt.err (!%p877_p5)
}
  0x2a   :  { %64 = dma.hbm_to_vmem [thread:$0]  %s1024_s4, 1024, %s59_s16, [#allocation8], %s889_s29, %s889_s29, %s890_s30  }
  0x2b   :  { %881 = dma.done.wait [#allocation3], 1024  }
  0x2c   :  { %882 = vsyncadd [#allocation3], 4294966272 }
  0x2d   :  { %883 = dma.done.wait [#allocation5], 2048  }
  0x2e   :  { %884 = vsyncadd [#allocation5], 4294965248 }
  0x2f   :  { %885 = dma.done.wait [#allocation8], 1024  }
  0x30   :  { %886 = vsyncadd [#allocation8], 4294966272  ;;  %v893_v0 = vmov 0.0   ;;  %vm894_vm0 = vmmov 0   ;;  %v748_v1 = vld [vmem:[#allocation2 + $0x38] sm:$0xff]   ;;  %v749_v2 = vld [vmem:[#allocation2 + $0x30] sm:$0xff]  }
  0x31   :  { %660 = vmatprep.subr.bf16.mxu0 %v893_v0  ;;  %676 = vmatprep.mubr.msk.bf16.mxu0 %vm894_vm0, %v893_v0  ;;  %v750_v3 = vld [vmem:[#allocation2 + $0x28] sm:$0xff]   ;;  %v757_v4 = vld [vmem:[#allocation4 + $0x38] sm:$0xff]   ;;  %v751_v5 = vld [vmem:[#allocation2 + $0x20] sm:$0xff]  }
  0x32   :  { %680 = vmatprep.subr.bf16.mxu1 %v893_v0  ;;  %696 = vmatprep.mubr.msk.bf16.mxu1 %vm894_vm0, %v893_v0  ;;  %v758_v6 = vld [vmem:[#allocation4 + $0x30] sm:$0xff]   ;;  %v752_v7 = vld [vmem:[#allocation2 + $0x18] sm:$0xff]   ;;  %v754_v9 = vld [vmem:[#allocation2 + $0x8] sm:$0xff]  }
  0x33   :  { %661 = vmatpush3.bf16.msra.mxu0 %v748_v1  ;;  %681 = vmatpush3.bf16.msra.mxu1 %v757_v4  ;;  %v753_v8 = vld [vmem:[#allocation2 + $0x10] sm:$0xff]   ;;  %v755_v10 = vld [vmem:[#allocation2] sm:$0xff]   ;;  %v759_v12 = vld [vmem:[#allocation4 + $0x28] sm:$0xff]  }
  0x34   :  { %662 = vmatprep.subr.bf16.mxu0 %v893_v0  ;;  %682 = vmatprep.subr.bf16.mxu1 %v893_v0  ;;  %v756_v11 = vld [vmem:[%s1020_s0] sm:$0xff]   ;;  %v761_v14 = vld [vmem:[#allocation4 + $0x18] sm:$0xff]   ;;  %v762_v15 = vld [vmem:[#allocation4 + $0x10] sm:$0xff]  }
  0x35   :  { %v760_v13 = vld [vmem:[#allocation4 + $0x20] sm:$0xff]   ;;  %v763_v16 = vld [vmem:[#allocation4 + $0x8] sm:$0xff]   ;;  %v765_v18 = vld [vmem:[#allocation6 + $0x38] sm:$0xff]  }
  0x36   :  { %v764_v17 = vld [vmem:[#allocation4] sm:$0xff]   ;;  %v766_v19 = vld [vmem:[#allocation6 + $0x30] sm:$0xff]   ;;  %v767_v30 = vld [vmem:[#allocation6 + $0x28] sm:$0xff]  }
  0x37   :  { %663 = vmatpush3.bf16.msra.mxu0 %v749_v2  ;;  %683 = vmatpush3.bf16.msra.mxu1 %v758_v6  ;;  %v587_v20 = vld [vmem:[%s1025_s5] ss:$0 sm:$0xff]  ;;  %v769_v32 = vld [vmem:[#allocation6 + $0x18] sm:$0xff]   ;;  %v770_v33 = vld [vmem:[#allocation6 + $0x10] sm:$0xff]  }
  0x38   :  { %664 = vmatprep.subr.bf16.mxu0 %v893_v0  ;;  %684 = vmatprep.subr.bf16.mxu1 %v893_v0  ;;  %v768_v31 = vld [vmem:[#allocation6 + $0x20] sm:$0xff]   ;;  %v771_v34 = vld [vmem:[#allocation6 + $0x8] sm:$0xff]   ;;  %v773_v36 = vld [vmem:[#allocation7 + $0x38] sm:$0xff]  }
  0x39   :  { %v772_v35 = vld [vmem:[#allocation6] sm:$0xff]   ;;  %v774_v37 = vld [vmem:[#allocation7 + $0x30] sm:$0xff]   ;;  %v775_v48 = vld [vmem:[#allocation7 + $0x28] sm:$0xff]  }
  0x3a   :  { %v597_v38 = vld [vmem:[%s1025_s5 + $0x1] ss:$0 sm:$0xff]  ;;  %v777_v50 = vld [vmem:[#allocation7 + $0x18] sm:$0xff]   ;;  %v778_v51 = vld [vmem:[#allocation7 + $0x10] sm:$0xff]  }
  0x3b   :  { %665 = vmatpush3.bf16.msra.mxu0 %v750_v3  ;;  %685 = vmatpush3.bf16.msra.mxu1 %v759_v12  ;;  %v776_v49 = vld [vmem:[#allocation7 + $0x20] sm:$0xff]   ;;  %v779_v52 = vld [vmem:[#allocation7 + $0x8] sm:$0xff]  }
  0x3c   :  { %666 = vmatprep.subr.bf16.mxu0 %v893_v0  ;;  %686 = vmatprep.subr.bf16.mxu1 %v893_v0  ;;  %v780_v53 = vld [vmem:[#allocation7] sm:$0xff]  }
  0x3d   :  { %v606_v54 = vld [vmem:[%s1025_s5 + $0x2] ss:$0 sm:$0xff] }
  0x3f   :  { %667 = vmatpush3.bf16.msra.mxu0 %v751_v5  ;;  %687 = vmatpush3.bf16.msra.mxu1 %v760_v13 }
  0x40   :  { %668 = vmatprep.subr.bf16.mxu0 %v893_v0  ;;  %688 = vmatprep.subr.bf16.mxu1 %v893_v0 }
  0x43   :  { %669 = vmatpush3.bf16.msra.mxu0 %v752_v7  ;;  %689 = vmatpush3.bf16.msra.mxu1 %v761_v14 }
  0x44   :  { %670 = vmatprep.subr.bf16.mxu0 %v893_v0  ;;  %690 = vmatprep.subr.bf16.mxu1 %v893_v0 }
  0x47   :  { %671 = vmatpush3.bf16.msra.mxu0 %v753_v8  ;;  %691 = vmatpush3.bf16.msra.mxu1 %v762_v15 }
  0x48   :  { %672 = vmatprep.subr.bf16.mxu0 %v893_v0  ;;  %692 = vmatprep.subr.bf16.mxu1 %v893_v0 }
  0x4b   :  { %673 = vmatpush3.bf16.msra.mxu0 %v754_v9  ;;  %693 = vmatpush3.bf16.msra.mxu1 %v763_v16 }
  0x4c   :  { %674 = vmatprep.subr.bf16.mxu0 %v893_v0  ;;  %694 = vmatprep.subr.bf16.mxu1 %v893_v0 }
  0x4f   :  { %675 = vmatpush3.bf16.msra.mxu0 %v755_v10  ;;  %695 = vmatpush3.bf16.msra.mxu1 %v764_v17 }
  0x50   :  { %700 = vmatprep.subr.bf16.mxu0 %v893_v0  ;;  %720 = vmatprep.subr.bf16.mxu1 %v893_v0 }
  0x52   :  { %677 = vmatmul.mubr.bf16.vlgmr.msra.gmra.mxu0 %v756_v11 }
  0x53   :  { %716 = vmatprep.mubr.msk.bf16.mxu0 %vm894_vm0, %v893_v0  ;;  %701 = vmatpush3.bf16.msra.mxu0 %v765_v18  ;;  %v541_v18 = vlaneseq }
  0x54   :  { %702 = vmatprep.subr.bf16.mxu0 %v893_v0 }
  0x57   :  { %703 = vmatpush3.bf16.msra.mxu0 %v766_v19 }
  0x58   :  { %704 = vmatprep.subr.bf16.mxu0 %v893_v0 }
  0x5b   :  { %705 = vmatpush3.bf16.msra.mxu0 %v767_v30 }
  0x5c   :  { %706 = vmatprep.subr.bf16.mxu0 %v893_v0 }
  0x5f   :  { %707 = vmatpush3.bf16.msra.mxu0 %v768_v31 }
  0x60   :  { %708 = vmatprep.subr.bf16.mxu0 %v893_v0 }
  0x63   :  { %709 = vmatpush3.bf16.msra.mxu0 %v769_v32 }
  0x64   :  { %710 = vmatprep.subr.bf16.mxu0 %v893_v0 }
  0x67   :  { %711 = vmatpush3.bf16.msra.mxu0 %v770_v33 }
  0x68   :  { %712 = vmatprep.subr.bf16.mxu0 %v893_v0 }
  0x6b   :  { %713 = vmatpush3.bf16.msra.mxu0 %v771_v34 }
  0x6c   :  { %714 = vmatprep.subr.bf16.mxu0 %v893_v0 }
  0x6f   :  { %715 = vmatpush3.bf16.msra.mxu0 %v772_v35 }
 0x112   :  { %v193_v21 = vpop.f32.mrf.mxu0 }
 0x113   :  { %v194_v22 = vadd.f32 %v587_v20, %v193_v21 }
 0x114   :  { %v678_v23 = vpop.f32.mrf.mxu0 }
 0x115   :  { %781 = vtanh.f32 %v194_v22  ;;  %v542_v23 = vand.u32 127, %v541_v18 }
 0x116   :  { %v196_v24 = vpop.f32.mrf.mxu0 }
 0x117   :  { %v197_v25 = vadd.f32 %v587_v20, %v196_v24  ;;  %vm575_vm3 = vcmp.ge.s32.totalorder %v542_v23, 64 }
 0x118   :  { %v679_v26 = vpop.f32.mrf.mxu0 }
 0x119   :  { %783 = vtanh.f32 %v197_v25 }
 0x122   :  { %v782_v27 = vpop.eup %781 }
 0x126   :  { %v784_v28 = vpop.eup %783 }
 0x127   :  { %v202_v29 = vpack.c.bf16 %v784_v28, %v782_v27 }
 0x129   :  { %697 = vmatmul.mubr.bf16.vlgmr.msra.gmra.mxu1 %v202_v29 }
 0x12a   :  { %736 = vmatprep.mubr.msk.bf16.mxu1 %vm894_vm0, %v893_v0  ;;  %721 = vmatpush3.bf16.msra.mxu1 %v773_v36 }
 0x12b   :  { %722 = vmatprep.subr.bf16.mxu1 %v893_v0 }
 0x12e   :  { %723 = vmatpush3.bf16.msra.mxu1 %v774_v37 }
 0x12f   :  { %724 = vmatprep.subr.bf16.mxu1 %v893_v0 }
 0x132   :  { %725 = vmatpush3.bf16.msra.mxu1 %v775_v48 }
 0x133   :  { %726 = vmatprep.subr.bf16.mxu1 %v893_v0 }
 0x136   :  { %727 = vmatpush3.bf16.msra.mxu1 %v776_v49 }
 0x137   :  { %728 = vmatprep.subr.bf16.mxu1 %v893_v0 }
 0x13a   :  { %729 = vmatpush3.bf16.msra.mxu1 %v777_v50 }
 0x13b   :  { %730 = vmatprep.subr.bf16.mxu1 %v893_v0 }
 0x13e   :  { %731 = vmatpush3.bf16.msra.mxu1 %v778_v51 }
 0x13f   :  { %732 = vmatprep.subr.bf16.mxu1 %v893_v0 }
 0x142   :  { %733 = vmatpush3.bf16.msra.mxu1 %v779_v52 }
 0x143   :  { %734 = vmatprep.subr.bf16.mxu1 %v893_v0  ;;  %v615_v0 = vld [vmem:[%s1026_s6] ss:$0 sm:$0xff] }
 0x146   :  { %735 = vmatpush3.bf16.msra.mxu1 %v780_v53 }
 0x1e9   :  { %v306_v39 = vpop.f32.mrf.mxu1 }
 0x1ea   :  { %v307_v40 = vadd.f32 %v597_v38, %v306_v39 }
 0x1eb   :  { %v698_v41 = vpop.f32.mrf.mxu1 }
 0x1ec   :  { %785 = vtanh.f32 %v307_v40 }
 0x1ed   :  { %v309_v42 = vpop.f32.mrf.mxu1 }
 0x1ee   :  { %v310_v43 = vadd.f32 %v597_v38, %v309_v42 }
 0x1ef   :  { %v699_v44 = vpop.f32.mrf.mxu1 }
 0x1f0   :  { %787 = vtanh.f32 %v310_v43 }
 0x1f9   :  { %v786_v45 = vpop.eup %785 }
 0x1fd   :  { %v788_v46 = vpop.eup %787 }
 0x1fe   :  { %v315_v47 = vpack.c.bf16 %v788_v46, %v786_v45 }
 0x200   :  { %717 = vmatmul.mubr.bf16.vlgmr.msra.gmra.mxu0 %v315_v47 }
 0x2c0   :  { %v419_v55 = vpop.f32.mrf.mxu0 }
 0x2c1   :  { %v420_v56 = vadd.f32 %v606_v54, %v419_v55 }
 0x2c2   :  { %v718_v57 = vpop.f32.mrf.mxu0 }
 0x2c3   :  { %789 = vtanh.f32 %v420_v56 }
 0x2c4   :  { %v422_v58 = vpop.f32.mrf.mxu0 }
 0x2c5   :  { %v423_v59 = vadd.f32 %v606_v54, %v422_v58 }
 0x2c6   :  { %v719_v60 = vpop.f32.mrf.mxu0 }
 0x2c7   :  { %791 = vtanh.f32 %v423_v59 }
 0x2d0   :  { %v790_v61 = vpop.eup %789 }
 0x2d4   :  { %v792_v62 = vpop.eup %791 }
 0x2d5   :  { %v428_v63 = vpack.c.bf16 %v792_v62, %v790_v61 }
 0x2d7   :  { %737 = vmatmul.mubr.bf16.vlgmr.msra.gmra.mxu1 %v428_v63 }
 0x397   :  { %v534_v1 = vpop.f32.mrf.mxu1 }
 0x398   :  { %v535_v2 = vadd.f32 %v615_v0, %v534_v1 }
 0x399   :  { %v738_v3 = vpop.f32.mrf.mxu1 }
 0x39a   :  { %v543_v4 = vadd.f32 0.54132485, %v535_v2 }
 0x39b   :  { %v537_v5 = vpop.f32.mrf.mxu1 }
 0x39c   :  { %v547_v6 = vmin.f32 %v543_v4, 20.0  ;;  %v538_v7 = vadd.f32 %v615_v0, %v537_v5  ;;  %vm545_vm2 = vcmp.gt.f32.partialorder %v543_v4, 20.0 }
 0x39d   :  { %v739_v8 = vpop.f32.mrf.mxu1 }
 0x39e   :  { %v549_v9 = vmul.f32 1.442695, %v547_v6  ;;  %v544_v10 = vadd.f32 0.54132485, %v538_v7 }
 0x3a0   :  { %793 = vpow2.f32 %v549_v9  ;;  %v548_v11 = vmin.f32 %v544_v10, 20.0  ;;  %vm546_vm5 = vcmp.gt.f32.partialorder %v544_v10, 20.0 }
 0x3a2   :  { %v551_v12 = vmul.f32 1.442695, %v548_v11 }
 0x3a4   :  { %795 = vpow2.f32 %v551_v12 }
 0x3ad   :  { %v794_v13 = vpop.eup %793 }
 0x3ae   :  { %v553_v14 = vadd.f32 1.0, %v794_v13  ;;  %v556_v17 = vmul.f32 -0.5, %v794_v13  ;;  %v559_v21 = vand.u32 2147483647, %v794_v13 }
 0x3b0   :  { %797 = vlog2.f32 %v553_v14  ;;  %v557_v19 = vadd.f32 1.0, %v556_v17  ;;  %vm560_vm1 = vcmp.lt.f32.partialorder %v559_v21, 0.0004427343 }
 0x3b1   :  { %v796_v15 = vpop.eup %795 }
 0x3b2   :  { %v562_v16 = vadd.f32 1.0, %v796_v15  ;;  %v565_v20 = vmul.f32 -0.5, %v796_v15  ;;  %v558_v25 = vmul.f32 %v794_v13, %v557_v19  ;;  %v568_v27 = vand.u32 2147483647, %v796_v15 }
 0x3b4   :  { %799 = vlog2.f32 %v562_v16  ;;  %v566_v26 = vadd.f32 1.0, %v565_v20  ;;  %vm569_vm4 = vcmp.lt.f32.partialorder %v568_v27, 0.0004427343 }
 0x3b6   :  { %v567_v33 = vmul.f32 %v796_v15, %v566_v26 }
 0x3bd   :  { %v798_v22 = vpop.eup %797 }
 0x3be   :  { %v555_v24 = vmul.f32 0.6931472, %v798_v22 }
 0x3c0   :  { %v561_v28 = vsel %vm560_vm1, %v558_v25, %v555_v24 }
 0x3c1   :  { %v800_v29 = vpop.eup %799  ;;  %v571_v30 = vsel %vm545_vm2, %v543_v4, %v561_v28 }
 0x3c2   :  { %v573_v31 = vmax.f32 %v571_v30, 0.0001  ;;  %v564_v32 = vmul.f32 0.6931472, %v800_v29 }
 0x3c4   :  { %v576_v34 = vsel %vm575_vm3, %v573_v31, %v535_v2  ;;  %v570_v35 = vsel %vm569_vm4, %v567_v33, %v564_v32 }
 0x3c5   :  { %578 = vst [vmem:[%s1027_s7] sm:$0xff] %v576_v34  ;;  %v572_v36 = vsel %vm546_vm5, %v544_v10, %v570_v35 }
 0x3c6   :  { %v574_v37 = vmax.f32 %v572_v36, 0.0001 }
 0x3c8   :  { %v577_v38 = vsel %vm575_vm3, %v574_v37, %v538_v7 }
 0x3c9   :  { %579 = vst [vmem:[%s1027_s7 + $0x8] sm:$0xff] %v577_v38 }
 0x3ca   :  { %584 = vsyncpa [#allocation3], 1 }
 0x3cb   :  { %585 = vsyncpa [#allocation5], 1 }
 0x3cc   :  { %586 = vsyncpa [#allocation8], 1 }

</bundles_post_ra>
